<compile_context>
chip_gen: v6e
topology: v6e:2x2x1
jax: 0.10.0
libtpu: 0.0.40
codegen_flags: <defaults>
</compile_context>

<pallas_src>
import jax
import jax.numpy as jnp
from jax.experimental import pallas as pl
from jax.experimental.pallas import tpu as pltpu


def _tv_kernel(x_ref, y_ref, h_acc_ref, w_acc_ref):
    """x_ref/y_ref: (TB, H, W) tiles.
    h_acc_ref: (1, H-1, W), w_acc_ref: (1, H, W-1) resident f32 accumulators."""
    i = pl.program_id(1)

    @pl.when(i == 0)
    def _():
        h_acc_ref[...] = jnp.zeros_like(h_acc_ref)
        w_acc_ref[...] = jnp.zeros_like(w_acc_ref)

    # Factor the difference once: (x1 - x0) - (y1 - y0) == d1 - d0 with d = x - y.
    d = x_ref[...].astype(jnp.float32) - y_ref[...].astype(jnp.float32)  # (TB, H, W)

    dh = d[:, 1:, :] - d[:, :-1, :]   # (TB, H-1, W)  vertical finite differences
    dw = d[:, :, 1:] - d[:, :, :-1]   # (TB, H, W-1)  horizontal finite differences

    # Reduce only along the leading (batch) axis: pure VPU adds, no XLU
    # cross-lane reduce and no masked sub-128-lane scalar store per step.
    h_acc_ref[0] += jnp.sum(dh * dh, axis=0)
    w_acc_ref[0] += jnp.sum(dw * dw, axis=0)


def tv_loss(x, y, tvloss_weight=1.0):
    """Pallas implementation of TVloss.forward(x, y).

    x, y: (N, C, H, W) arrays (same shape/dtype).  Returns a scalar f32.
    """
    assert x.shape == y.shape, "x and y must have the same shape"
    n, c, h, w = x.shape
    assert h >= 2 and w >= 2, "TV loss requires H >= 2 and W >= 2"
    nc = n * c

    x_f = x.reshape(nc, h, w)
    y_f = y.reshape(nc, h, w)

    # ---- choose images-per-block (TB) and the core-parallel split (P) --------
    P = 2  # leading "parallel" axis; sharded across TensorCores on multi-TC chips

    itemsize = jnp.dtype(x.dtype).itemsize
    # VMEM estimate per batched image: 2 inputs x 2 pipeline buffers of the raw
    # tile + ~5 f32 intermediates (d, dh, dw, their squares / partial sums).
    per_image_bytes = 2 * 2 * h * w * itemsize + 5 * h * w * 4
    vmem_budget = 12 * 1024 * 1024  # conservative: fits v5e/v6e/v7x scoped VMEM
    tb = int(max(1, min(vmem_budget // per_image_bytes, pl.cdiv(nc, P))))
    steps = int(pl.cdiv(nc, P * tb))
    nc_pad = P * tb * steps

    if nc_pad != nc:
        pad = nc_pad - nc
        # Zero padding contributes nothing: d = 0 - 0 for padded images.
        x_f = jnp.concatenate([x_f, jnp.zeros((pad, h, w), x_f.dtype)], axis=0)
        y_f = jnp.concatenate([y_f, jnp.zeros((pad, h, w), y_f.dtype)], axis=0)

    h_acc, w_acc = pl.pallas_call(
        _tv_kernel,
        out_shape=(
            jax.ShapeDtypeStruct((P, h - 1, w), jnp.float32),
            jax.ShapeDtypeStruct((P, h, w - 1), jnp.float32),
        ),
        grid_spec=pltpu.PrefetchScalarGridSpec(
            num_scalar_prefetch=0,
            grid=(P, steps),
            in_specs=[
                pl.BlockSpec((tb, h, w), lambda p, i: (p * steps + i, 0, 0)),
                pl.BlockSpec((tb, h, w), lambda p, i: (p * steps + i, 0, 0)),
            ],
            out_specs=[
                pl.BlockSpec((1, h - 1, w), lambda p, i: (p, 0, 0)),
                pl.BlockSpec((1, h, w - 1), lambda p, i: (p, 0, 0)),
            ],
        ),
        compiler_params=pltpu.CompilerParams(
            dimension_semantics=("parallel", "arbitrary"),
            vmem_limit_bytes=32 * 1024 * 1024,
        ),
    )(x_f, y_f)

    # Final cheap reduce + MSE normalization + 0.5 * weight scaling in JAX.
    h_sum = jnp.sum(h_acc)
    w_sum = jnp.sum(w_acc)
    mse_h = h_sum / jnp.float32(nc * (h - 1) * w)
    mse_w = w_sum / jnp.float32(nc * h * (w - 1))
    return jnp.float32(tvloss_weight) * (mse_h + mse_w) * jnp.float32(0.5)


def _reference_tv_loss(x, y, tvloss_weight=1.0):
    """Pure-JAX reference mirroring the PyTorch forward, for verification."""
    x = x.astype(jnp.float32)
    y = y.astype(jnp.float32)
    w_tv_x = x[:, :, :, 1:] - x[:, :, :, :-1]
    w_tv_y = y[:, :, :, 1:] - y[:, :, :, :-1]
    h_tv_x = x[:, :, 1:, :] - x[:, :, :-1, :]
    h_tv_y = y[:, :, 1:, :] - y[:, :, :-1, :]
    mse_h = jnp.mean((h_tv_x - h_tv_y) ** 2)
    mse_w = jnp.mean((w_tv_x - w_tv_y) ** 2)
    return tvloss_weight * (mse_h + mse_w) * 0.5


if __name__ == "__main__":
    key = jax.random.PRNGKey(0)

    # Case 1: nc divides evenly into the (P, TB) split.
    kx, ky = jax.random.split(key)
    B, C, H, W = 2, 4, 16, 16
    x = jax.random.normal(kx, (B, C, H, W), dtype=jnp.float32)
    y = jax.random.normal(ky, (B, C, H, W), dtype=jnp.float32)
    out = jax.block_until_ready(tv_loss(x, y, tvloss_weight=1.0))
    ref = jax.block_until_ready(_reference_tv_loss(x, y, tvloss_weight=1.0))
    assert jnp.allclose(out, ref, rtol=1e-5, atol=1e-6), (out, ref)

    # Case 2: odd nc to exercise the zero-padded remainder path.
    kx2, ky2 = jax.random.split(jax.random.PRNGKey(1))
    x2 = jax.random.normal(kx2, (1, 5, 16, 16), dtype=jnp.float32)
    y2 = jax.random.normal(ky2, (1, 5, 16, 16), dtype=jnp.float32)
    out2 = jax.block_until_ready(tv_loss(x2, y2, tvloss_weight=2.0))
    ref2 = jax.block_until_ready(_reference_tv_loss(x2, y2, tvloss_weight=2.0))
    assert jnp.allclose(out2, ref2, rtol=1e-5, atol=1e-6), (out2, ref2)

    print("KERNEL_OK")
</pallas_src>

<mosaic_0001>
module attributes {stable_mosaic.version = 11 : i64} {
  func.func @_tv_kernel(%arg0: i32, %arg1: i32, %arg2: memref<4x16x16xf32, #tpu.memory_space<vmem>>, %arg3: memref<4x16x16xf32, #tpu.memory_space<vmem>>, %arg4: memref<1x15x16xf32, #tpu.memory_space<vmem>>, %arg5: memref<1x16x15xf32, #tpu.memory_space<vmem>>) attributes {dimension_semantics = [#tpu.dimension_semantics<parallel>, #tpu.dimension_semantics<arbitrary>], iteration_bounds = array<i64: 2, 1>, scalar_prefetch = 0 : i64, scratch_operands = 0 : i64, tpu.core_type = #tpu.core_type<tc>, window_params = [{transform_indices = @transform_0, window_bounds = array<i64: 4, 16, 16>}, {transform_indices = @transform_1, window_bounds = array<i64: 4, 16, 16>}, {transform_indices = @transform_2, window_bounds = array<i64: 1, 15, 16>}, {transform_indices = @transform_3, window_bounds = array<i64: 1, 16, 15>}]} {
    %c0_i32 = arith.constant 0 : i32
    %0 = arith.cmpi eq, %arg1, %c0_i32 : i32
    %1 = arith.extui %0 : i1 to i32
    %c0_i32_0 = arith.constant 0 : i32
    %2 = arith.cmpi ne, %1, %c0_i32_0 : i32
    scf.if %2 {
      %cst_19 = arith.constant 0.000000e+00 : f32
      %28 = vector.broadcast %cst_19 : f32 to vector<1x15x16xf32>
      %c0_20 = arith.constant 0 : index
      %c0_21 = arith.constant 0 : index
      %c0_22 = arith.constant 0 : index
      %29 = vector.load %arg4[%c0_20, %c0_21, %c0_22] : memref<1x15x16xf32, #tpu.memory_space<vmem>>, vector<1x15x16xf32>
      tpu.vector_store %arg4[%c0_20, %c0_21, %c0_22], %28 {strides = array<i32>} : memref<1x15x16xf32, #tpu.memory_space<vmem>>, vector<1x15x16xf32>,
      %cst_23 = arith.constant 0.000000e+00 : f32
      %30 = vector.broadcast %cst_23 : f32 to vector<1x16x15xf32>
      %c0_24 = arith.constant 0 : index
      %c0_25 = arith.constant 0 : index
      %c0_26 = arith.constant 0 : index
      %31 = vector.load %arg5[%c0_24, %c0_25, %c0_26] : memref<1x16x15xf32, #tpu.memory_space<vmem>>, vector<1x16x15xf32>
      tpu.vector_store %arg5[%c0_24, %c0_25, %c0_26], %30 {strides = array<i32>} : memref<1x16x15xf32, #tpu.memory_space<vmem>>, vector<1x16x15xf32>,
    } else {
    }
    %c0 = arith.constant 0 : index
    %c0_1 = arith.constant 0 : index
    %c0_2 = arith.constant 0 : index
    %3 = vector.load %arg2[%c0, %c0_1, %c0_2] : memref<4x16x16xf32, #tpu.memory_space<vmem>>, vector<4x16x16xf32>
    %c0_3 = arith.constant 0 : index
    %c0_4 = arith.constant 0 : index
    %c0_5 = arith.constant 0 : index
    %4 = vector.load %arg3[%c0_3, %c0_4, %c0_5] : memref<4x16x16xf32, #tpu.memory_space<vmem>>, vector<4x16x16xf32>
    %5 = arith.subf %3, %4 : vector<4x16x16xf32>
    %6 = vector.extract_strided_slice %5 {offsets = [0, 1, 0], sizes = [4, 15, 16], strides = [1, 1, 1]} : vector<4x16x16xf32> to vector<4x15x16xf32>
    %7 = vector.extract_strided_slice %5 {offsets = [0, 0, 0], sizes = [4, 15, 16], strides = [1, 1, 1]} : vector<4x16x16xf32> to vector<4x15x16xf32>
    %8 = arith.subf %6, %7 : vector<4x15x16xf32>
    %9 = vector.extract_strided_slice %5 {offsets = [0, 0, 1], sizes = [4, 16, 15], strides = [1, 1, 1]} : vector<4x16x16xf32> to vector<4x16x15xf32>
    %10 = vector.extract_strided_slice %5 {offsets = [0, 0, 0], sizes = [4, 16, 15], strides = [1, 1, 1]} : vector<4x16x16xf32> to vector<4x16x15xf32>
    %11 = arith.subf %9, %10 : vector<4x16x15xf32>
    %c0_6 = arith.constant 0 : index
    %c0_7 = arith.constant 0 : index
    %c0_8 = arith.constant 0 : index
    %12 = vector.load %arg4[%c0_6, %c0_7, %c0_8] : memref<1x15x16xf32, #tpu.memory_space<vmem>>, vector<1x15x16xf32>
    %13 = vector.shape_cast %12 : vector<1x15x16xf32> to vector<15x16xf32>
    %14 = arith.mulf %8, %8 : vector<4x15x16xf32>
    %cst = arith.constant dense<0.000000e+00> : vector<15x16xf32>
    %15 = vector.multi_reduction <add>, %14, %cst [0] : vector<4x15x16xf32> to vector<15x16xf32>
    %16 = arith.addf %13, %15 : vector<15x16xf32>
    %c0_9 = arith.constant 0 : index
    %c0_10 = arith.constant 0 : index
    %c0_11 = arith.constant 0 : index
    %17 = vector.load %arg4[%c0_9, %c0_10, %c0_11] : memref<1x15x16xf32, #tpu.memory_space<vmem>>, vector<1x15x16xf32>
    %18 = vector.shape_cast %17 : vector<1x15x16xf32> to vector<15x16xf32>
    %19 = vector.shape_cast %16 : vector<15x16xf32> to vector<1x15x16xf32>
    tpu.vector_store %arg4[%c0_9, %c0_10, %c0_11], %19 {strides = array<i32>} : memref<1x15x16xf32, #tpu.memory_space<vmem>>, vector<1x15x16xf32>,
    %c0_12 = arith.constant 0 : index
    %c0_13 = arith.constant 0 : index
    %c0_14 = arith.constant 0 : index
    %20 = vector.load %arg5[%c0_12, %c0_13, %c0_14] : memref<1x16x15xf32, #tpu.memory_space<vmem>>, vector<1x16x15xf32>
    %21 = vector.shape_cast %20 : vector<1x16x15xf32> to vector<16x15xf32>
    %22 = arith.mulf %11, %11 : vector<4x16x15xf32>
    %cst_15 = arith.constant dense<0.000000e+00> : vector<16x15xf32>
    %23 = vector.multi_reduction <add>, %22, %cst_15 [0] : vector<4x16x15xf32> to vector<16x15xf32>
    %24 = arith.addf %21, %23 : vector<16x15xf32>
    %c0_16 = arith.constant 0 : index
    %c0_17 = arith.constant 0 : index
    %c0_18 = arith.constant 0 : index
    %25 = vector.load %arg5[%c0_16, %c0_17, %c0_18] : memref<1x16x15xf32, #tpu.memory_space<vmem>>, vector<1x16x15xf32>
    %26 = vector.shape_cast %25 : vector<1x16x15xf32> to vector<16x15xf32>
    %27 = vector.shape_cast %24 : vector<16x15xf32> to vector<1x16x15xf32>
    tpu.vector_store %arg5[%c0_16, %c0_17, %c0_18], %27 {strides = array<i32>} : memref<1x16x15xf32, #tpu.memory_space<vmem>>, vector<1x16x15xf32>,
    return
  }
  func.func @transform_0(%arg0: i32, %arg1: i32) -> (i32, i32, i32) {
    %c1_i32 = arith.constant 1 : i32
    %0 = arith.muli %arg0, %c1_i32 : i32
    %1 = arith.addi %0, %arg1 : i32
    %c0_i32 = arith.constant 0 : i32
    %c0_i32_0 = arith.constant 0 : i32
    %c0_i32_1 = arith.constant 0 : i32
    return %1, %c0_i32, %c0_i32_0 : i32, i32, i32
  }
  func.func @transform_1(%arg0: i32, %arg1: i32) -> (i32, i32, i32) {
    %c1_i32 = arith.constant 1 : i32
    %0 = arith.muli %arg0, %c1_i32 : i32
    %1 = arith.addi %0, %arg1 : i32
    %c0_i32 = arith.constant 0 : i32
    %c0_i32_0 = arith.constant 0 : i32
    %c0_i32_1 = arith.constant 0 : i32
    return %1, %c0_i32, %c0_i32_0 : i32, i32, i32
  }
  func.func @transform_2(%arg0: i32, %arg1: i32) -> (i32, i32, i32) {
    %c0_i32 = arith.constant 0 : i32
    %c0_i32_0 = arith.constant 0 : i32
    %c0_i32_1 = arith.constant 0 : i32
    return %arg0, %c0_i32, %c0_i32_0 : i32, i32, i32
  }
  func.func @transform_3(%arg0: i32, %arg1: i32) -> (i32, i32, i32) {
    %c0_i32 = arith.constant 0 : i32
    %c0_i32_0 = arith.constant 0 : i32
    %c0_i32_1 = arith.constant 0 : i32
    return %arg0, %c0_i32, %c0_i32_0 : i32, i32, i32
  }
}

</mosaic_0001>

<bundles_post_ra>
// kernel: tpu_custom_call.1
= control target key start
LH: loop header
LB: loop body
LE: loop exit
PB: predicated region body
PF: predicated region fallthrough
CT: control target
= control target key end

     0   :  { %9 = vsyncpa [#allocation3], 0  ;;  %s1052_s0 = inlined_call_operand.hbm [shape: f32[8,16,16], index: 0, kind: input, shape index: {}]   ;;  %s1053_s1 = inlined_call_operand.hbm [shape: f32[8,16,16], index: 1, kind: input, shape index: {}]   ;;  %s1054_s2 = inlined_call_operand.vmem [shape: f32[2,15,16], index: 2, kind: output, shape index: {0}]   ;;  %s1055_s3 = inlined_call_operand.vmem [shape: f32[2,16,15], index: 3, kind: output, shape index: {1}]  }
   0x1   :  { %11 = vsyncpa [#allocation3 + $0x1], 0 }
   0x2   :  { %12 = vsyncpa [#allocation5], 0 }
   0x3   :  { %14 = vsyncpa [#allocation5 + $0x1], 0  ;;  %s813_s12 = smov 0   ;;  %s815_s13 = smov 0  }
   0x4   :  { %s817_s14 = smov 0   ;;  %s819_s15 = smov 0  }
   0x5   :  { %s821_s16 = smov 0   ;;  %s823_s17 = smov 0  }
   0x6 LB: > { %s582_s18 = sadd.s32 4294967295, %s784_s17   ;;  %s32_s19 = sadd.s32 1, %s780_s16  ;;  %s784_s17 = sphi %s823_s17, %s20_s17   ;;  %s780_s16 = sphi %s821_s16, %s1064_s16   ;;  %s776_s15 = sphi %s819_s15, %s1063_s15   ;;  %s772_s14 = sphi %s817_s14, %s1062_s14   ;;  %s768_s13 = sphi %s815_s13, %s1061_s13   ;;  %s764_s12 = sphi %s813_s12, %s1060_s12  }
   0x7   : > { %p34_p0 = scmp.ge.s32.totalorder %s32_s19, 2  ;;  %s41_s20 = sadd.s32 1, %s772_s14 }
   0x8   : > { %p48_p1 = scmp.ne.s32.totalorder %s772_s14, %s768_s13  ;;  %p49_p2 = scmp.eq.s32.totalorder %s784_s17, 0 }
   0x9   : > { %s1066_s19 = smov (%p34_p0, %s32_s19), 0  ;;  %p54_p4 = scmp.ne.s32.totalorder %s768_s13, %s764_s12 }
   0xa   : > { %p849_p3 = por %p49_p2, %p48_p1  ;;  %s38_s22 = ssub.s32 %s780_s16, %s1066_s19 }
   0xb   : > { %p55_p5 = scmp.eq.s32.totalorder %s582_s18, 0  ;;  %p39_p6 = scmp.eq.s32.totalorder %s38_s22, 0 }
   0xc   : > { %p620_p8 = scmp.lt.s32.totalorder %s784_s17, 2  ;;  %s865_s25 = sand.u32 1, %s772_s14  }
   0xd   : > { %p856_p7 = por %p55_p5, %p54_p4  ;;  %s604_s26 = sshll.u32 %s780_s16, 10 }
   0xe   : > { %s862_s24 = scalar_select %p39_p6, %s772_s14, %s41_s20  }
   0xf   : > { %s586_s27 = sshll.u32 %s865_s25, 6  ;;  %s170_s30 = scalar_lea.hbm %s1052_s0, %s604_s26 }
  0x10   : > { %s162_s4 = scalar_lea.vmem [#allocation2], %s586_s27  ;;  %p876_p9 = pnand %p620_p8, %p849_p3 }
  0x11   : > { %s171_s5 = sshll.u32 %s162_s4, 4  ;;  %s159_s7 = scalar_lea.sflag [#allocation3], %s865_s25  ;;  %s172_s5 = int_to_ptr.vmem [resolvable:$true] %s171_s5 }
  0x12   : > { %p676_p10 = pneg %p876_p9  ;;  %s687_s8 = scalar_lea.vmem %s172_s5, 1024 }
  0x13   : > { %p688_p11 = scmp.ne.s32.totalorder %s172_s5, %s687_s8  ;;  %s786_s9 = smov [#allocation2]  }
  0x14   : > { %s692_s10 = sshll.u32 %s786_s9, 4  ;;  %s693_s10 = int_to_ptr.vmem [resolvable:$false] %s692_s10 }
  0x15   : > { %p690_p12 = pnand %p688_p11, %p676_p10  ;;  %s694_s11 = scalar_lea.vmem %s693_s10, 2048 }
  0x16   : > { %p695_p0 = scmp.lt.s32.totalorder %s172_s5, %s693_s10  ;;  %p696_p1 = scmp.lt.s32.totalorder %s694_s11, %s687_s8 }
  0x17   : > { %p691_p13 = pneg %p690_p12 }
  0x18   : > { %p697_p2 = por %p696_p1, %p695_p0 }
  0x1a   : > { %p698_p3 = pnand %p697_p2, %p691_p13 }
  0x1c   : > { %701 = shalt.err (!%p698_p3)
}
  0x1d   : > { %s787_s12 = smov 128   ;;  %s788_s18 = smov 8  }
  0x1e   : > { %616 = dma.hbm_to_vmem [thread:$0]  (!%p876_p9), %s170_s30, 1024, %s172_s5, %s159_s7, %s787_s12, %s787_s12, %s788_s18  }
  0x1f   : > { %p594_p4 = scmp.ge.s32.totalorder %s784_s17, 1  ;;  %p202_p5 = scmp.lt.s32.totalorder %s784_s17, 3 }
  0x20   : > { %s193_s28 = scalar_lea.hbm %s1053_s1, %s604_s26  ;;  %s185_s29 = scalar_lea.vmem [#allocation4], %s586_s27 }
  0x21   : > { %p890_p6 = pnand %p594_p4, %p202_p5  ;;  %s194_s4 = sshll.u32 %s185_s29, 4  ;;  %s195_s4 = int_to_ptr.vmem [resolvable:$true] %s194_s4 }
  0x22   : > { %s182_s8 = scalar_lea.sflag [#allocation5], %s865_s25  ;;  %s715_s9 = scalar_lea.vmem %s195_s4, 1024 }
  0x23   : > { %p716_p8 = scmp.ne.s32.totalorder %s195_s4, %s715_s9  ;;  %s789_s30 = smov [#allocation4]  }
  0x24   : > { %s720_s5 = sshll.u32 %s789_s30, 4  ;;  %s721_s5 = int_to_ptr.vmem [resolvable:$false] %s720_s5 }
  0x25   : > { %p718_p11 = pnand %p716_p8, %p676_p10  ;;  %s722_s7 = scalar_lea.vmem %s721_s5, 2048 }
  0x26   : > { %p723_p13 = scmp.lt.s32.totalorder %s195_s4, %s721_s5  ;;  %p724_p0 = scmp.lt.s32.totalorder %s722_s7, %s715_s9 }
  0x27   : > { %p719_p12 = pneg %p718_p11 }
  0x28   : > { %p725_p1 = por %p724_p0, %p723_p13 }
  0x2a   : > { %p726_p2 = pnand %p725_p1, %p719_p12 }
  0x2c   : > { %729 = shalt.err (!%p726_p2)
}
  0x2d   : > { %619 = dma.hbm_to_vmem [thread:$0]  (!%p876_p9), %s193_s28, 1024, %s195_s4, %s182_s8, %s787_s12, %s787_s12, %s788_s18  }
  0x2e   : > { %206 = sbr.rel (%p890_p6) target bundleno = 310 (0x136), region = 28  ;;  %s208_s25 = sand.u32 (!%p890_p6), 1, %s768_s13  }
  0x2f   : > { %s595_s26 = sshll.u32 (!%p890_p6), %s208_s25, 6  ;;  %s209_s27 = scalar_lea.sflag (!%p890_p6), [#allocation3], %s208_s25 }
  0x30   : > { %s908_s10 = scalar_lea.vmem (!%p890_p6), [#allocation2], %s595_s26 }
  0x33   : > { %755 = dma.done.wait (%p856_p7), %s209_s27, 1024  }
  0x34   : > { %757 = vsyncadd (%p856_p7), %s209_s27, 4294966272  ;;  %s218_s11 = scalar_lea.sflag [#allocation5], %s208_s25  ;;  %s221_s21 = scalar_lea.vmem [#allocation4], %s595_s26 }
  0x35   : > { %759 = dma.done.wait (%p856_p7), %s218_s11, 1024  }
  0x36   : > { %761 = vsyncadd (%p856_p7), %s218_s11, 4294966272  ;;  %v281_v0 = vld [vmem:[%s908_s10 + $0x10] sm:$0xff]  ;;  %v279_v2 = vld [vmem:[%s908_s10] sm:$0xff]  ;;  %s790_s23 = smov 1   ;;  %p258_p7 = scmp.lt.s32.totalorder %s776_s15, 1  ;;  %vm274_vm0 = vcmask 129024  }
  0x37   : > { %v289_v1 = vld [vmem:[%s221_s21 + $0x10] sm:$0xff]  ;;  %v287_v4 = vld [vmem:[%s221_s21] sm:$0xff]  ;;  %v282_v5 = vld [vmem:[%s908_s10 + $0x18] sm:$0xff]  ;;  %vm276_vm1 = vcmask 121856   ;;  %vm272_vm2 = vcmask 130048   ;;  %v791_v24 = vmov 0.0  }
  0x38   : > { %v920_v3 = vsub.f32 %v281_v0, %v289_v1  ;;  %v290_v6 = vld [vmem:[%s221_s21 + $0x18] sm:$0xff]  ;;  %v923_v7 = vsub.f32 %v279_v2, %v287_v4  ;;  %v280_v8 = vld [vmem:[%s908_s10 + $0x8] sm:$0xff]  ;;  %v283_v14 = vld [vmem:[%s908_s10 + $0x20] sm:$0xff]  ;;  %s1068_s15 = smov (!%p258_p7, %s776_s15), 1  ;;  %vm311_vm3 = vcmask 1040384   ;;  %vm382_vm4 = vcmask 130049  }
  0x39   : > { %v288_v9 = vld [vmem:[%s221_s21 + $0x8] sm:$0xff]  ;;  %v928_v10 = vsub.f32 %v282_v5, %v290_v6  ;;  %v291_v15 = vld [vmem:[%s221_s21 + $0x20] sm:$0xff]  ;;  %v286_v18 = vld [vmem:[%s908_s10 + $0x38] sm:$0xff]  ;;  %s607_s6 = sshll.u32 %s1068_s15, 4  ;;  %vm400_vm5 = vcmask 1046528   ;;  %vm421_vm6 = vcmask 130056  }
  0x3a   : > { %344 = vrot.lane.b32.xlu1 %v920_v3, %s790_s23  ;;  %340 = vrot.lane.b32.xlu0 %v923_v7, %s790_s23  ;;  %v932_v11 = vsub.f32 %v280_v8, %v288_v9  ;;  %v284_v12 = vld [vmem:[%s908_s10 + $0x28] sm:$0xff]  ;;  %v942_v17 = vsub.f32 %v283_v14, %v291_v15  ;;  %v294_v19 = vld [vmem:[%s221_s21 + $0x38] sm:$0xff]  ;;  %s961_s20 = scalar_lea.vmem %s1054_s2, %s607_s6  ;;  %s966_s29 = scalar_lea.vmem %s1055_s3, %s607_s6  ;;  %v315_v25 = vrot.slane %v920_v3, 7  ;;  %v312_v27 = vrot.slane %v923_v7, 7 }
  0x3b   : > { %v292_v13 = vld [vmem:[%s221_s21 + $0x28] sm:$0xff]  ;;  %v285_v20 = vld [vmem:[%s908_s10 + $0x30] sm:$0xff]  ;;  %v949_v22 = vsub.f32 %v286_v18, %v294_v19  ;;  %273 = vst.msk [vmem:[%s961_s20] sm:$0xff] %vm272_vm2, %v791_v24  ;;  %v316_v26 = vrot.slane %v928_v10, 7  ;;  %s792_s15 = smov 127  }
  0x3c   : > { %v938_v16 = vsub.f32 %v284_v12, %v292_v13  ;;  %v293_v21 = vld [vmem:[%s221_s21 + $0x30] sm:$0xff]  ;;  %275 = vst.msk [vmem:[%s961_s20 + $0x8] sm:$0x7f] %vm274_vm0, %v791_v24  ;;  %v313_v28 = vrot.slane %v932_v11, 7  ;;  %v318_v32 = vrot.slane %v942_v17, 7  ;;  %v334_v33 = vsub.f32 %v920_v3, %v315_v25 }
  0x3d   : > { %v953_v23 = vsub.f32 %v285_v20, %v293_v21  ;;  %278 = vst.msk [vmem:[%s966_s29 + $0x8] sm:$0xff] %vm276_vm1, %v791_v24  ;;  %277 = vst.msk [vmem:[%s966_s29] sm:$0xff] %vm276_vm1, %v791_v24  ;;  %v317_v29 = vsel %vm311_vm3, %v315_v25, %v316_v26  ;;  %v332_v34 = vsub.f32 %v923_v7, %v312_v27  ;;  %v322_v38 = vrot.slane %v949_v22, 7 }
  0x3e   : > { %346 = vrot.lane.b32.xlu1 %v928_v10, %s790_s23  ;;  %342 = vrot.lane.b32.xlu0 %v932_v11, %s790_s23  ;;  %v314_v30 = vsel %vm311_vm3, %v312_v27, %v313_v28  ;;  %v319_v31 = vrot.slane %v938_v16, 7  ;;  %v335_v35 = vsub.f32 %v928_v10, %v317_v29  ;;  %v376_v40 = vmul.f32 %v334_v33, %v334_v33 }
  0x3f   : > { %v333_v36 = vsub.f32 %v932_v11, %v314_v30  ;;  %v321_v39 = vrot.slane %v953_v23, 7  ;;  %v374_v41 = vmul.f32 %v332_v34, %v332_v34  ;;  %v336_v43 = vsub.f32 %v942_v17, %v318_v32 }
  0x40   : > { %v320_v37 = vsel %vm311_vm3, %v318_v32, %v319_v31  ;;  %v377_v42 = vmul.f32 %v335_v35, %v335_v35  ;;  %v384_v47 = vsel %vm382_vm4, %v376_v40, 0.0 }
  0x41   : > { %v375_v44 = vmul.f32 %v333_v36, %v333_v36  ;;  %v337_v45 = vsub.f32 %v938_v16, %v320_v37  ;;  %v323_v46 = vsel %vm311_vm3, %v321_v39, %v322_v38  ;;  %v383_v48 = vsel %vm382_vm4, %v374_v41, 0.0 }
  0x42   : > { %350 = vrot.lane.b32.xlu1 %v938_v16, %s790_s23  ;;  %348 = vrot.lane.b32.xlu0 %v942_v17, %s790_s23  ;;  %v392_v49 = vsel %vm272_vm2, %v377_v42, 0.0  ;;  %v378_v50 = vmul.f32 %v336_v43, %v336_v43  ;;  %v338_v53 = vsub.f32 %v953_v23, %v321_v39  ;;  %v339_v54 = vsub.f32 %v949_v22, %v323_v46  ;;  %v372_v19 = vld [vmem:[%s961_s20] sm:$0xff] }
  0x43   : > { %v391_v51 = vsel %vm272_vm2, %v375_v44, 0.0  ;;  %v379_v52 = vmul.f32 %v337_v45, %v337_v45  ;;  %v385_v55 = vadd.f32 %v384_v47, %v383_v48  ;;  %v373_v20 = vld [vmem:[%s961_s20 + $0x8] sm:$0x7f] }
  0x44   : > { %v393_v56 = vadd.f32 %v392_v49, %v391_v51  ;;  %v386_v57 = vsel %vm382_vm4, %v378_v50, 0.0  ;;  %v380_v59 = vmul.f32 %v338_v53, %v338_v53  ;;  %v381_v60 = vmul.f32 %v339_v54, %v339_v54  ;;  %v412_v49 = vld [vmem:[%s966_s29 + $0x8] sm:$0xff]  ;;  %v411_v50 = vld [vmem:[%s966_s29] sm:$0xff] }
  0x45   : > { %v394_v58 = vsel %vm272_vm2, %v379_v52, 0.0  ;;  %v387_v61 = vadd.f32 %v386_v57, %v385_v55 }
  0x46   : > { %354 = vrot.lane.b32.xlu1 %v949_v22, %s790_s23  ;;  %352 = vrot.lane.b32.xlu0 %v953_v23, %s790_s23  ;;  %v395_v62 = vadd.f32 %v394_v58, %v393_v56  ;;  %v388_v63 = vsel %vm382_vm4, %v380_v59, 0.0  ;;  %v396_v0 = vsel %vm272_vm2, %v381_v60, 0.0 }
  0x47   : > { %v389_v1 = vadd.f32 %v388_v63, %v387_v61 }
  0x48   : > { %v397_v2 = vadd.f32 %v396_v0, %v395_v62 }
  0x49   : > { %v401_v6 = vrot.slane %v389_v1, 1 }
  0x4a   : > { %v402_v8 = vrot.slane %v397_v2, 1 }
  0x4c   : > { %v403_v21 = vsel %vm400_vm5, %v401_v6, %v402_v8  ;;  %v407_v26 = vadd.f32 %v402_v8, %v373_v20 }
  0x4d   : > { %v406_v25 = vadd.f32 %v403_v21, %v372_v19 }
  0x4e   : > { %410 = vst.msk [vmem:[%s961_s20 + $0x8] sm:$0x7f] %vm274_vm0, %v407_v26 }
  0x4f   : > { %408 = vst.msk [vmem:[%s961_s20] sm:$0xff] %vm272_vm2, %v406_v25 }
  0xac   : > { %v345_v4 = vpop.permute.xlu1 %344  ;;  %v341_v5 = vpop.permute.xlu0 %340 }
  0xad   : > { %v366_v9 = vsub.f32 %v920_v3, %v345_v4  ;;  %v364_v12 = vsub.f32 %v923_v7, %v341_v5 }
  0xaf   : > { %v415_v27 = vmul.f32 %v366_v9, %v366_v9  ;;  %v413_v28 = vmul.f32 %v364_v12, %v364_v12 }
  0xb0   : > { %v347_v13 = vpop.permute.xlu1 %346  ;;  %v343_v15 = vpop.permute.xlu0 %342 }
  0xb1   : > { %v367_v14 = vsub.f32 %v928_v10, %v347_v13  ;;  %v365_v18 = vsub.f32 %v932_v11, %v343_v15  ;;  %v423_v33 = vsel %vm421_vm6, %v415_v27, 0.0  ;;  %v422_v34 = vsel %vm421_vm6, %v413_v28, 0.0 }
  0xb2   : > { %v424_v41 = vadd.f32 %v423_v33, %v422_v34 }
  0xb3   : > { %v416_v24 = vmul.f32 %v367_v14, %v367_v14  ;;  %v414_v29 = vmul.f32 %v365_v18, %v365_v18 }
  0xb4   : > { %v351_v3 = vpop.permute.xlu1 %350  ;;  %v349_v30 = vpop.permute.xlu0 %348 }
  0xb5   : > { %v369_v7 = vsub.f32 %v938_v16, %v351_v3  ;;  %v368_v10 = vsub.f32 %v942_v17, %v349_v30  ;;  %v430_v11 = vsel %vm421_vm6, %v416_v24, 0.0  ;;  %v429_v31 = vsel %vm421_vm6, %v414_v29, 0.0 }
  0xb6   : > { %v431_v39 = vadd.f32 %v430_v11, %v429_v31 }
  0xb7   : > { %v418_v32 = vmul.f32 %v369_v7, %v369_v7  ;;  %v417_v35 = vmul.f32 %v368_v10, %v368_v10 }
  0xb8   : > { %v355_v36 = vpop.permute.xlu1 %354  ;;  %v353_v38 = vpop.permute.xlu0 %352 }
  0xb9   : > { %v432_v16 = vsel %vm421_vm6, %v418_v32, 0.0  ;;  %v371_v37 = vsub.f32 %v949_v22, %v355_v36  ;;  %v425_v17 = vsel %vm421_vm6, %v417_v35, 0.0  ;;  %v370_v40 = vsub.f32 %v953_v23, %v353_v38 }
  0xba   : > { %v433_v43 = vadd.f32 %v432_v16, %v431_v39  ;;  %v426_v45 = vadd.f32 %v425_v17, %v424_v41 }
  0xbb   : > { %v420_v42 = vmul.f32 %v371_v37, %v371_v37  ;;  %v419_v44 = vmul.f32 %v370_v40, %v370_v40 }
  0xbd   : > { %v434_v46 = vsel %vm421_vm6, %v420_v42, 0.0  ;;  %v427_v47 = vsel %vm421_vm6, %v419_v44, 0.0 }
  0xbe   : > { %v435_v22 = vadd.f32 %v434_v46, %v433_v43  ;;  %v428_v48 = vadd.f32 %v427_v47, %v426_v45 }
  0xc0   : > { %440 = vrot.lane.b32.xlu1 %v435_v22, %s792_s15  ;;  %438 = vrot.lane.b32.xlu0 %v428_v48, %s792_s15 }
 0x132   : > { %v441_v51 = vpop.permute.xlu1 %440  ;;  %v439_v52 = vpop.permute.xlu0 %438 }
 0x133   : > { %v445_v23 = vadd.f32 %v441_v51, %v412_v49  ;;  %v444_v53 = vadd.f32 %v439_v52, %v411_v50 }
 0x135   : > { %448 = vst.msk [vmem:[%s966_s29 + $0x8] sm:$0xff] %vm276_vm1, %v445_v23  ;;  %447 = vst.msk [vmem:[%s966_s29] sm:$0xff] %vm276_vm1, %v444_v53 }
 0x136 PF: > { %s20_s17 = sadd.s32 1, %s784_s17   ;;  %s1060_s12 = smov %s768_s13 }
 0x137   : > { %p17_p9 = scmp.ge.s32.totalorder %s20_s17, 4   ;;  %s1061_s13 = smov %s772_s14 }
 0x138   : > { %s1062_s14 = smov %s862_s24  ;;  %s1063_s15 = smov %s780_s16 }
 0x139   : > { %s1064_s16 = smov %s1066_s19  ;;  %19 = sbr.rel (!%p17_p9) target bundleno = 6 (0x6), region = 97 }
 0x13e   :  { %486 = vsyncpa [#allocation3], 1 }
 0x13f   :  { %488 = vsyncpa [#allocation3 + $0x1], 1 }
 0x140   :  { %489 = vsyncpa [#allocation5], 1 }
 0x141   :  { %491 = vsyncpa [#allocation5 + $0x1], 1 }

</bundles_post_ra>
